<compile_context>
chip_gen: v5e
topology: v5e:2x2
jax: 0.10.0
libtpu: 0.0.40
codegen_flags: <defaults>
</compile_context>

<pallas_src>
import jax
import jax.numpy as jnp
import numpy as np
from jax.experimental import pallas as pl
from jax.experimental.pallas import tpu as pltpu

_TM_MAX = 512  # max folded-row tile


def _round_up(a, b):
    return (a + b - 1) // b * b


def _fused_deconv_bn_relu_kernel(x_ref, w_ref, scale_ref, shift_ref, o_ref):
    # (TM, R*Cin) @ (R*Cin, R*C4) on the MXU, then BN affine + ReLU on the VPU.
    y = jnp.dot(x_ref[...], w_ref[...], preferred_element_type=jnp.float32)
    o_ref[...] = jnp.maximum(y * scale_ref[...] + shift_ref[...], 0.0)


def deconv_forward(x, weight, bias, gamma, beta, eps=1e-5):
    """ConvTranspose2d(k=2, s=2) + BatchNorm2d (training batch stats) + ReLU.

    x:      (N, Cin, H, W) float32  (PyTorch NCHW)
    weight: (Cin, Cout, 2, 2)       (PyTorch ConvTranspose2d weight layout)
    bias, gamma, beta: (Cout,)
    returns (N, Cout, 2H, 2W) float32
    """
    del bias  # absorbed exactly by train-mode BatchNorm (mean shifts by the same constant)
    N, Cin, H, W = x.shape
    Cout = weight.shape[1]
    M = N * H * W
    C4 = 4 * Cout

    x_flat = jnp.transpose(x, (0, 2, 3, 1)).reshape(M, Cin)
    # (Cin, 4*Cout) weight matrix, columns ordered (kh, kw, co).
    w_mat = jnp.transpose(weight, (0, 2, 3, 1)).reshape(Cin, C4)

    # ---- BN batch stats from colsum(X) + Gram matrix (no materialization of y). ----
    count = jnp.float32(M * 4)
    csum = jnp.sum(x_flat, axis=0)                                        # (Cin,)
    gram = jnp.dot(x_flat.T, x_flat, preferred_element_type=jnp.float32)  # (Cin, Cin)
    col_sum = csum @ w_mat                                                # (C4,)
    col_sumsq = jnp.sum((gram @ w_mat) * w_mat, axis=0)                   # (C4,)
    mean_c = col_sum.reshape(4, Cout).sum(axis=0) / count                 # bias-free batch mean
    ex2_c = col_sumsq.reshape(4, Cout).sum(axis=0) / count
    var_c = jnp.maximum(ex2_c - mean_c * mean_c, 0.0)                     # biased var (PyTorch train BN)
    scale_c = gamma / jnp.sqrt(var_c + eps)
    shift_c = beta - mean_c * scale_c

    # ---- Fold rows into lanes when 4*Cout < 128 so the output stores are lane-dense.
    R = max(1, 128 // C4) if C4 < 128 else 1

    M_r = _round_up(M, R)
    Mf = M_r // R                      # folded row count

    # Pick the largest row tile whose double-buffered blocks stay within a VMEM budget
    # that is safe on every generation (v7x: 64 MiB physical / 32 MiB scoped default).
    TM = _TM_MAX
    while TM > 8 and 4 * 2 * TM * (R * Cin + R * C4) > (40 << 20):
        TM //= 2
    TM = min(TM, _round_up(Mf, 8))

    Mf_pad = _round_up(Mf, TM)
    M_pad = Mf_pad * R

    x_pad = jnp.pad(x_flat, ((0, M_pad - M), (0, 0)))
    x_fold = x_pad.reshape(Mf_pad, R * Cin)          # free row-major reshape

    if R > 1:
        eye_r = jnp.eye(R, dtype=w_mat.dtype)
        # Block-diagonal weight: folded row block r only multiplies its own copy of W.
        w_big = jnp.einsum("rs,ck->rcsk", eye_r, w_mat).reshape(R * Cin, R * C4)
    else:
        w_big = w_mat

    scale_row = jnp.tile(scale_c, 4 * R).reshape(1, R * C4)
    shift_row = jnp.tile(shift_c, 4 * R).reshape(1, R * C4)

    grid = (Mf_pad // TM,)

    # VMEM budget: double-buffered x/weight/scale/shift/output blocks (f32) + headroom,
    # capped so it never exceeds what v7x can offer.
    block_bytes = 4 * (TM * R * Cin + R * Cin * R * C4 + 2 * R * C4 + TM * R * C4)
    vmem_limit = int(min(max(4 * block_bytes, 16 << 20), 48 << 20))

    z = pl.pallas_call(
        _fused_deconv_bn_relu_kernel,
        out_shape=jax.ShapeDtypeStruct((Mf_pad, R * C4), jnp.float32),
        grid_spec=pltpu.PrefetchScalarGridSpec(
            num_scalar_prefetch=0,
            grid=grid,
            in_specs=[
                pl.BlockSpec((TM, R * Cin), lambda i: (i, 0)),
                pl.BlockSpec((R * Cin, R * C4), lambda i: (0, 0)),
                pl.BlockSpec((1, R * C4), lambda i: (0, 0)),
                pl.BlockSpec((1, R * C4), lambda i: (0, 0)),
            ],
            out_specs=pl.BlockSpec((TM, R * C4), lambda i: (i, 0)),
        ),
        compiler_params=pltpu.CompilerParams(
            dimension_semantics=("parallel",),   # no accumulator -> megacore-friendly
            vmem_limit_bytes=vmem_limit,
        ),
    )(x_fold, w_big, scale_row, shift_row)

    # Unfold + scatter the 2x2 kernel positions back into the 2x-upsampled NCHW output.
    z = z.reshape(M_pad, C4)[:M]
    out = z.reshape(N, H, W, 2, 2, Cout)          # (n, h, w, kh, kw, co)
    out = jnp.transpose(out, (0, 5, 1, 3, 2, 4))  # (n, co, h, kh, w, kw)
    return out.reshape(N, Cout, 2 * H, 2 * W)


def _reference(x, weight, bias, gamma, beta, eps=1e-5):
    # Pure-JAX reference with identical semantics for correctness checking.
    N, Cin, H, W = x.shape
    Cout = weight.shape[1]
    y = jnp.einsum("nchw,cokl->nohkwl", x, weight)     # (n, co, h, kh, w, kw)
    y = y.reshape(N, Cout, 2 * H, 2 * W) + bias[None, :, None, None]
    mean = y.mean(axis=(0, 2, 3), keepdims=True)
    var = y.var(axis=(0, 2, 3), keepdims=True)         # biased (PyTorch train-mode BN)
    yhat = (y - mean) / jnp.sqrt(var + eps)
    y = yhat * gamma[None, :, None, None] + beta[None, :, None, None]
    return jnp.maximum(y, 0.0)


if __name__ == "__main__":
    key = jax.random.PRNGKey(0)
    k1, k2, k3, k4, k5 = jax.random.split(key, 5)
    N, Cin, Cout, H, W = 2, 4, 8, 16, 16

    x = jax.random.normal(k1, (N, Cin, H, W), jnp.float32)
    # Deterministic synthetic parameters (shapes from ConvTranspose2d / BatchNorm2d init).
    weight = jax.random.normal(k2, (Cin, Cout, 2, 2), jnp.float32) * 0.5
    bias = jax.random.normal(k3, (Cout,), jnp.float32) * 0.1
    gamma = 1.0 + 0.1 * jax.random.normal(k4, (Cout,), jnp.float32)
    beta = 0.1 * jax.random.normal(k5, (Cout,), jnp.float32)

    out = deconv_forward(x, weight, bias, gamma, beta)
    out = jax.block_until_ready(out)

    ref = _reference(x, weight, bias, gamma, beta)
    np.testing.assert_allclose(np.asarray(out), np.asarray(ref), rtol=1e-4, atol=1e-4)
    print("KERNEL_OK")
</pallas_src>

<mosaic_0001>
module attributes {stable_mosaic.version = 11 : i64} {
  func.func @_fused_deconv_bn_relu_kernel(%arg0: i32, %arg1: memref<128x16xf32, #tpu.memory_space<vmem>>, %arg2: memref<16x128xf32, #tpu.memory_space<vmem>>, %arg3: memref<1x128xf32, #tpu.memory_space<vmem>>, %arg4: memref<1x128xf32, #tpu.memory_space<vmem>>, %arg5: memref<128x128xf32, #tpu.memory_space<vmem>>) attributes {dimension_semantics = [#tpu.dimension_semantics<parallel>], iteration_bounds = array<i64: 1>, scalar_prefetch = 0 : i64, scratch_operands = 0 : i64, tpu.core_type = #tpu.core_type<tc>, window_params = [{transform_indices = @transform_0, window_bounds = array<i64: 128, 16>}, {pipeline_mode = #tpu.pipeline_mode<synchronous>, transform_indices = @transform_1, window_bounds = array<i64: 16, 128>}, {pipeline_mode = #tpu.pipeline_mode<synchronous>, transform_indices = @transform_2, window_bounds = array<i64: 1, 128>}, {pipeline_mode = #tpu.pipeline_mode<synchronous>, transform_indices = @transform_3, window_bounds = array<i64: 1, 128>}, {transform_indices = @transform_4, window_bounds = array<i64: 128, 128>}]} {
    %c0 = arith.constant 0 : index
    %c0_0 = arith.constant 0 : index
    %0 = vector.load %arg1[%c0, %c0_0] : memref<128x16xf32, #tpu.memory_space<vmem>>, vector<128x16xf32>
    %c0_1 = arith.constant 0 : index
    %c0_2 = arith.constant 0 : index
    %1 = vector.load %arg2[%c0_1, %c0_2] : memref<16x128xf32, #tpu.memory_space<vmem>>, vector<16x128xf32>
    %cst = arith.constant dense<0.000000e+00> : vector<128x128xf32>
    %2 = tpu.matmul %0, %1, %cst {dimension_numbers = #tpu.dot_dimension_numbers<[1], [0], [0], [1], [0, 0, 1, 1], [], []>} : vector<128x16xf32>, vector<16x128xf32>, vector<128x128xf32> -> vector<128x128xf32>
    %c0_3 = arith.constant 0 : index
    %c0_4 = arith.constant 0 : index
    %3 = vector.load %arg3[%c0_3, %c0_4] : memref<1x128xf32, #tpu.memory_space<vmem>>, vector<1x128xf32>
    %4 = vector.broadcast %3 : vector<1x128xf32> to vector<128x128xf32>
    %5 = arith.mulf %2, %4 : vector<128x128xf32>
    %c0_5 = arith.constant 0 : index
    %c0_6 = arith.constant 0 : index
    %6 = vector.load %arg4[%c0_5, %c0_6] : memref<1x128xf32, #tpu.memory_space<vmem>>, vector<1x128xf32>
    %7 = vector.broadcast %6 : vector<1x128xf32> to vector<128x128xf32>
    %8 = arith.addf %5, %7 : vector<128x128xf32>
    %cst_7 = arith.constant 0.000000e+00 : f32
    %9 = vector.broadcast %cst_7 : f32 to vector<128x128xf32>
    %10 = arith.maximumf %8, %9 : vector<128x128xf32>
    %c0_8 = arith.constant 0 : index
    %c0_9 = arith.constant 0 : index
    %11 = vector.load %arg5[%c0_8, %c0_9] : memref<128x128xf32, #tpu.memory_space<vmem>>, vector<128x128xf32>
    tpu.vector_store %arg5[%c0_8, %c0_9], %10 {strides = array<i32>} : memref<128x128xf32, #tpu.memory_space<vmem>>, vector<128x128xf32>,
    return
  }
  func.func @transform_0(%arg0: i32) -> (i32, i32) {
    %c0_i32 = arith.constant 0 : i32
    %c0_i32_0 = arith.constant 0 : i32
    return %arg0, %c0_i32 : i32, i32
  }
  func.func @transform_1(%arg0: i32) -> (i32, i32) {
    %c0_i32 = arith.constant 0 : i32
    %c0_i32_0 = arith.constant 0 : i32
    %c0_i32_1 = arith.constant 0 : i32
    return %c0_i32, %c0_i32_0 : i32, i32
  }
  func.func @transform_2(%arg0: i32) -> (i32, i32) {
    %c0_i32 = arith.constant 0 : i32
    %c0_i32_0 = arith.constant 0 : i32
    %c0_i32_1 = arith.constant 0 : i32
    return %c0_i32, %c0_i32_0 : i32, i32
  }
  func.func @transform_3(%arg0: i32) -> (i32, i32) {
    %c0_i32 = arith.constant 0 : i32
    %c0_i32_0 = arith.constant 0 : i32
    %c0_i32_1 = arith.constant 0 : i32
    return %c0_i32, %c0_i32_0 : i32, i32
  }
  func.func @transform_4(%arg0: i32) -> (i32, i32) {
    %c0_i32 = arith.constant 0 : i32
    %c0_i32_0 = arith.constant 0 : i32
    return %arg0, %c0_i32 : i32, i32
  }
}

</mosaic_0001>

<bundles_post_ra>
// kernel: tpu_custom_call.1
= control target key start
LH: loop header
LB: loop body
LE: loop exit
PB: predicated region body
PF: predicated region fallthrough
CT: control target
= control target key end

     0   :  { %vm36_vm0 = vcmask 130048   ;;  %s436_s0 = inlined_call_operand.vmem [shape: f32[128,16], index: 0, kind: input, shape index: {}]   ;;  %s437_s1 = inlined_call_operand.vmem [shape: f32[16,128], index: 1, kind: input, shape index: {}]   ;;  %s438_s2 = inlined_call_operand.vmem [shape: f32[1,128], index: 2, kind: input, shape index: {}]   ;;  %s439_s3 = inlined_call_operand.vmem [shape: f32[1,128], index: 3, kind: input, shape index: {}]   ;;  %s440_s4 = inlined_call_operand.hbm [shape: f32[128,128], index: 4, kind: output, shape index: {}]  }
   0x1   :  { %v35_v0 = vld [vmem:[%s437_s1 + $0x8] sm:$0xff]  ;;  %v34_v1 = vld [vmem:[%s437_s1] sm:$0xff] }
   0x2   :  { %257 = vmatpush.msra.mxu2 %v35_v0  ;;  %258 = vmatpush.msra.mxu3 %v35_v0  ;;  %v26_v2 = vld [vmem:[%s436_s0 + $0x40] sm:$0xff] }
   0x3   :  { %v30_v3 = vld [vmem:[%s436_s0 + $0x60] sm:$0xff]  ;;  %99 = vmatpush.msra.mxu0 %v35_v0  ;;  %256 = vmatpush.msra.mxu1 %v35_v0 }
   0x4   :  { %260 = vmatpush.msra.mxu2 %v34_v1  ;;  %261 = vmatpush.msra.mxu3 %v34_v1  ;;  %v18_v4 = vld [vmem:[%s436_s0] sm:$0xff] }
   0x5   :  { %v22_v5 = vld [vmem:[%s436_s0 + $0x20] sm:$0xff]  ;;  %248 = vmatmul.msk.f32.vlgmr.msra.gmra.mxu2 %vm36_vm0, %v26_v2  ;;  %252 = vmatmul.msk.f32.vlgmr.msra.gmra.mxu3 %vm36_vm0, %v30_v3 }
   0x6   :  { %100 = vmatpush.msra.mxu0 %v34_v1  ;;  %259 = vmatpush.msra.mxu1 %v34_v1 }
   0x7   :  { %240 = vmatmul.msk.f32.vlgmr.msra.gmra.mxu0 %vm36_vm0, %v18_v4  ;;  %244 = vmatmul.msk.f32.vlgmr.msra.gmra.mxu1 %vm36_vm0, %v22_v5 }
   0x8   :  { %9 = vsyncpa [#allocation3], 0  ;;  %v27_v6 = vld [vmem:[%s436_s0 + $0x48] sm:$0xff]  ;;  %v28_v10 = vld [vmem:[%s436_s0 + $0x50] sm:$0xff]  ;;  %s228_s28 = sshll.u32 %s440_s4, 4  ;;  %s294_s29 = smov 128   ;;  %s229_s28 = int_to_ptr.hbm [resolvable:$true] %s228_s28 }
   0x9   :  { %v31_v7 = vld [vmem:[%s436_s0 + $0x68] sm:$0xff]  ;;  %v32_v11 = vld [vmem:[%s436_s0 + $0x70] sm:$0xff]  ;;  %v29_v14 = vld [vmem:[%s436_s0 + $0x58] sm:$0xff]  ;;  %s295_s30 = smov 8  }
   0xa   :  { %v19_v8 = vld [vmem:[%s436_s0 + $0x8] sm:$0xff]  ;;  %v20_v12 = vld [vmem:[%s436_s0 + $0x10] sm:$0xff]  ;;  %v33_v15 = vld [vmem:[%s436_s0 + $0x78] sm:$0xff] }
   0xb   :  { %v23_v9 = vld [vmem:[%s436_s0 + $0x28] sm:$0xff]  ;;  %v24_v13 = vld [vmem:[%s436_s0 + $0x30] sm:$0xff]  ;;  %v21_v16 = vld [vmem:[%s436_s0 + $0x18] sm:$0xff] }
   0xc   :  { %v25_v17 = vld [vmem:[%s436_s0 + $0x38] sm:$0xff]  ;;  %v394_v18 = vld [vmem:[%s438_s2] ss:$0 sm:$0xff]  ;;  %s293_s0 = smov [#allocation2]  }
   0xd   :  { %249 = vmatmul.msk.f32.gmra.mxu2 %vm36_vm0, %v27_v6  ;;  %253 = vmatmul.msk.f32.gmra.mxu3 %vm36_vm0, %v31_v7  ;;  %v399_v19 = vld [vmem:[%s439_s3] ss:$0 sm:$0xff]  ;;  %s226_s2 = sshll.u32 %s293_s0, 4  ;;  %s227_s2 = int_to_ptr.vmem [resolvable:$true] %s226_s2 }
   0xf   :  { %241 = vmatmul.msk.f32.gmra.mxu0 %vm36_vm0, %v19_v8  ;;  %245 = vmatmul.msk.f32.gmra.mxu1 %vm36_vm0, %v23_v9 }
  0x15   :  { %250 = vmatmul.msk.f32.gmra.mxu2 %vm36_vm0, %v28_v10  ;;  %254 = vmatmul.msk.f32.gmra.mxu3 %vm36_vm0, %v32_v11 }
  0x17   :  { %242 = vmatmul.msk.f32.gmra.mxu0 %vm36_vm0, %v20_v12  ;;  %246 = vmatmul.msk.f32.gmra.mxu1 %vm36_vm0, %v24_v13 }
  0x1d   :  { %251 = vmatmul.msk.f32.gmra.mxu2 %vm36_vm0, %v29_v14  ;;  %255 = vmatmul.msk.f32.gmra.mxu3 %vm36_vm0, %v33_v15 }
  0x1f   :  { %243 = vmatmul.msk.f32.gmra.mxu0 %vm36_vm0, %v21_v16  ;;  %247 = vmatmul.msk.f32.gmra.mxu1 %vm36_vm0, %v25_v17 }
  0x84   :  { %v102_v20 = vpop.f32.mrf.mxu0  ;;  %v114_v21 = vpop.f32.mrf.mxu1 }
  0x85   :  { %v154_v22 = vmul.f32 %v394_v18, %v102_v20  ;;  %v158_v23 = vmul.f32 %v394_v18, %v114_v21 }
  0x87   :  { %v174_v24 = vadd.f32 %v399_v19, %v154_v22  ;;  %v178_v25 = vadd.f32 %v399_v19, %v158_v23 }
  0x88   :  { %v126_v26 = vpop.f32.mrf.mxu2  ;;  %v138_v27 = vpop.f32.mrf.mxu3 }
  0x89   :  { %v190_v28 = vmax.f32 %v174_v24, 0.0  ;;  %v194_v29 = vmax.f32 %v178_v25, 0.0  ;;  %v162_v30 = vmul.f32 %v394_v18, %v126_v26  ;;  %v166_v31 = vmul.f32 %v394_v18, %v138_v27 }
  0x8b   :  { %206 = vst [vmem:[#allocation2] sm:$0xff] %v190_v28  ;;  %v182_v32 = vadd.f32 %v399_v19, %v162_v30  ;;  %v186_v33 = vadd.f32 %v399_v19, %v166_v31 }
  0x8c   :  { %210 = vst [vmem:[#allocation2 + $0x20] sm:$0xff] %v194_v29  ;;  %v105_v34 = vpop.f32.mrf.mxu0  ;;  %v117_v35 = vpop.f32.mrf.mxu1 }
  0x8d   :  { %v198_v36 = vmax.f32 %v182_v32, 0.0  ;;  %v202_v37 = vmax.f32 %v186_v33, 0.0  ;;  %v155_v38 = vmul.f32 %v394_v18, %v105_v34  ;;  %v159_v39 = vmul.f32 %v394_v18, %v117_v35 }
  0x8f   :  { %214 = vst [vmem:[#allocation2 + $0x40] sm:$0xff] %v198_v36  ;;  %v175_v40 = vadd.f32 %v399_v19, %v155_v38  ;;  %v179_v41 = vadd.f32 %v399_v19, %v159_v39 }
  0x90   :  { %218 = vst [vmem:[#allocation2 + $0x60] sm:$0xff] %v202_v37  ;;  %v129_v42 = vpop.f32.mrf.mxu2  ;;  %v141_v43 = vpop.f32.mrf.mxu3 }
  0x91   :  { %v191_v44 = vmax.f32 %v175_v40, 0.0  ;;  %v195_v45 = vmax.f32 %v179_v41, 0.0  ;;  %v163_v46 = vmul.f32 %v394_v18, %v129_v42  ;;  %v167_v47 = vmul.f32 %v394_v18, %v141_v43 }
  0x93   :  { %207 = vst [vmem:[#allocation2 + $0x8] sm:$0xff] %v191_v44  ;;  %v183_v48 = vadd.f32 %v399_v19, %v163_v46  ;;  %v187_v49 = vadd.f32 %v399_v19, %v167_v47 }
  0x94   :  { %211 = vst [vmem:[#allocation2 + $0x28] sm:$0xff] %v195_v45  ;;  %v108_v50 = vpop.f32.mrf.mxu0  ;;  %v120_v51 = vpop.f32.mrf.mxu1 }
  0x95   :  { %v199_v52 = vmax.f32 %v183_v48, 0.0  ;;  %v203_v53 = vmax.f32 %v187_v49, 0.0  ;;  %v156_v54 = vmul.f32 %v394_v18, %v108_v50  ;;  %v160_v55 = vmul.f32 %v394_v18, %v120_v51 }
  0x97   :  { %215 = vst [vmem:[#allocation2 + $0x48] sm:$0xff] %v199_v52  ;;  %v176_v56 = vadd.f32 %v399_v19, %v156_v54  ;;  %v180_v57 = vadd.f32 %v399_v19, %v160_v55 }
  0x98   :  { %219 = vst [vmem:[#allocation2 + $0x68] sm:$0xff] %v203_v53  ;;  %v132_v58 = vpop.f32.mrf.mxu2  ;;  %v144_v59 = vpop.f32.mrf.mxu3 }
  0x99   :  { %v192_v60 = vmax.f32 %v176_v56, 0.0  ;;  %v196_v61 = vmax.f32 %v180_v57, 0.0  ;;  %v164_v62 = vmul.f32 %v394_v18, %v132_v58  ;;  %v168_v63 = vmul.f32 %v394_v18, %v144_v59 }
  0x9b   :  { %208 = vst [vmem:[#allocation2 + $0x10] sm:$0xff] %v192_v60  ;;  %v184_v0 = vadd.f32 %v399_v19, %v164_v62  ;;  %v188_v1 = vadd.f32 %v399_v19, %v168_v63 }
  0x9c   :  { %212 = vst [vmem:[#allocation2 + $0x30] sm:$0xff] %v196_v61  ;;  %v111_v2 = vpop.f32.mrf.mxu0  ;;  %v123_v3 = vpop.f32.mrf.mxu1 }
  0x9d   :  { %v200_v4 = vmax.f32 %v184_v0, 0.0  ;;  %v204_v5 = vmax.f32 %v188_v1, 0.0  ;;  %v157_v6 = vmul.f32 %v394_v18, %v111_v2  ;;  %v161_v7 = vmul.f32 %v394_v18, %v123_v3 }
  0x9f   :  { %216 = vst [vmem:[#allocation2 + $0x50] sm:$0xff] %v200_v4  ;;  %v177_v8 = vadd.f32 %v399_v19, %v157_v6  ;;  %v181_v9 = vadd.f32 %v399_v19, %v161_v7 }
  0xa0   :  { %220 = vst [vmem:[#allocation2 + $0x70] sm:$0xff] %v204_v5  ;;  %v135_v10 = vpop.f32.mrf.mxu2  ;;  %v147_v11 = vpop.f32.mrf.mxu3 }
  0xa1   :  { %v193_v12 = vmax.f32 %v177_v8, 0.0  ;;  %v197_v13 = vmax.f32 %v181_v9, 0.0  ;;  %v165_v14 = vmul.f32 %v394_v18, %v135_v10  ;;  %v169_v15 = vmul.f32 %v394_v18, %v147_v11 }
  0xa3   :  { %209 = vst [vmem:[#allocation2 + $0x18] sm:$0xff] %v193_v12  ;;  %v185_v16 = vadd.f32 %v399_v19, %v165_v14  ;;  %v189_v17 = vadd.f32 %v399_v19, %v169_v15 }
  0xa4   :  { %213 = vst [vmem:[#allocation2 + $0x38] sm:$0xff] %v197_v13 }
  0xa5   :  { %v201_v20 = vmax.f32 %v185_v16, 0.0  ;;  %v205_v21 = vmax.f32 %v189_v17, 0.0 }
  0xa7   :  { %217 = vst [vmem:[#allocation2 + $0x58] sm:$0xff] %v201_v20 }
  0xa8   :  { %221 = vst [vmem:[#allocation2 + $0x78] sm:$0xff] %v205_v21 }
  0xa9   :  { %234 = dma.vmem_to_hbm [thread:$0]  %s227_s2, 2048, %s229_s28, [#allocation3], %s294_s29, %s294_s29, %s295_s30  }
  0xaa   :  { %291 = dma.done.wait [#allocation3], 2048  }
  0xab   :  { %292 = vsyncadd [#allocation3], 4294965248 }
  0xac   :  { %239 = vsyncpa [#allocation3], 1 }

</bundles_post_ra>
